<compile_context>
chip_gen: v5e
topology: v5e:2x2
jax: 0.10.0
libtpu: 0.0.40
codegen_flags: <defaults>
</compile_context>

<pallas_src>
import functools

import jax
import jax.numpy as jnp
from jax.experimental import pallas as pl
from jax.experimental.pallas import tpu as pltpu

LANE = 128


def _round_up(x, m):
    return -(-x // m) * m


# ----------------------------- Pallas kernel ------------------------------ #
def _graph_conv_kernel(a_ref, x_ref, w_ref, b_ref, o_ref, acc_ref, *,
                       apply_relu, xw_first):
    k = pl.program_id(1)

    @pl.when(k == 0)
    def _():
        acc_ref[...] = jnp.zeros_like(acc_ref)

    if xw_first:
        # (X_k @ W) first (DGL GraphConv order when F_out <= F_in): the small
        # per-tile XW matmul, then the dominant N^2 aggregation at width F_out.
        xw = jnp.dot(x_ref[...], w_ref[...],
                     preferred_element_type=jnp.float32)
        acc_ref[...] += jnp.dot(a_ref[...], xw.astype(a_ref.dtype),
                                preferred_element_type=jnp.float32)
    else:
        # Aggregate first, apply W in the epilogue (when F_in < F_out).
        acc_ref[...] += jnp.dot(a_ref[...], x_ref[...],
                                preferred_element_type=jnp.float32)

    @pl.when(k == pl.num_programs(1) - 1)
    def _():
        if xw_first:
            h = acc_ref[...]
        else:
            h = jnp.dot(acc_ref[...].astype(w_ref.dtype), w_ref[...],
                        preferred_element_type=jnp.float32)
        h = h + b_ref[...]            # b is (1, F_out_pad), broadcasts over rows
        if apply_relu:
            h = jnp.maximum(h, 0.0)
        o_ref[...] = h.astype(o_ref.dtype)


def graph_conv_padded(a_p, x_p, w_p, b_p, *, apply_relu, out_dtype,
                      tile_m=128, tile_k=128):
    """One GraphConv layer on pre-padded operands.

    a_p: (Np, Np) bf16     x_p: (Np, Fin_p) bf16
    w_p: (Fin_p, Fout_p) bf16     b_p: (1, Fout_p) f32
    returns (Np, Fout_p) in `out_dtype`.
    """
    n_p = a_p.shape[0]
    f_in_p, f_out_p = w_p.shape
    assert n_p % tile_m == 0 and n_p % tile_k == 0

    # Reorder the two matmuls based on (padded) feature widths.
    xw_first = f_out_p <= f_in_p
    width = f_out_p if xw_first else f_in_p

    kernel = functools.partial(_graph_conv_kernel,
                               apply_relu=apply_relu, xw_first=xw_first)

    flops = 2 * n_p * n_p * width + 2 * n_p * f_in_p * f_out_p
    bytes_accessed = (a_p.size * a_p.dtype.itemsize
                      + x_p.size * x_p.dtype.itemsize
                      + w_p.size * w_p.dtype.itemsize
                      + b_p.size * b_p.dtype.itemsize
                      + n_p * f_out_p * jnp.dtype(out_dtype).itemsize)

    return pl.pallas_call(
        kernel,
        out_shape=jax.ShapeDtypeStruct((n_p, f_out_p), out_dtype),
        grid_spec=pltpu.PrefetchScalarGridSpec(
            num_scalar_prefetch=0,
            grid=(n_p // tile_m, n_p // tile_k),
            in_specs=[
                pl.BlockSpec((tile_m, tile_k), lambda i, k: (i, k)),   # A_hat
                pl.BlockSpec((tile_k, f_in_p), lambda i, k: (k, 0)),   # X
                pl.BlockSpec((f_in_p, f_out_p), lambda i, k: (0, 0)),  # W
                pl.BlockSpec((1, f_out_p), lambda i, k: (0, 0)),       # b
            ],
            out_specs=pl.BlockSpec((tile_m, f_out_p), lambda i, k: (i, 0)),
            scratch_shapes=[pltpu.VMEM((tile_m, width), jnp.float32)],
        ),
        compiler_params=pltpu.CompilerParams(
            dimension_semantics=("parallel", "arbitrary")),
        cost_estimate=pl.CostEstimate(flops=flops, transcendentals=0,
                                      bytes_accessed=bytes_accessed),
    )(a_p, x_p, w_p, b_p)


# ------------------------------ GCN wrapper -------------------------------- #
def init_gcn_params(key, in_feats, hidden_size, num_classes):
    """Deterministic Glorot-uniform-ish init for the 4 GraphConv layers."""
    def glorot(k, fan_in, fan_out):
        limit = jnp.sqrt(6.0 / (fan_in + fan_out))
        return jax.random.uniform(k, (fan_in, fan_out), jnp.float32,
                                  -limit, limit)
    ks = jax.random.split(key, 4)
    return {
        "conv1": {"w": glorot(ks[0], in_feats, hidden_size),
                  "b": jnp.zeros((1, hidden_size), jnp.float32)},
        "conv3": {"w": glorot(ks[1], hidden_size, hidden_size),
                  "b": jnp.zeros((1, hidden_size), jnp.float32)},
        "conv4": {"w": glorot(ks[2], hidden_size, hidden_size),
                  "b": jnp.zeros((1, hidden_size), jnp.float32)},
        "conv2": {"w": glorot(ks[3], hidden_size, num_classes),
                  "b": jnp.zeros((1, num_classes), jnp.float32)},
    }


def normalize_adjacency(adj):
    """A_hat = D^-1/2 A D^-1/2 (DGL norm='both'); with self-loops the degree
    clamp >=1 is equivalent to DGL's zeroing of isolated nodes."""
    deg = jnp.clip(adj.sum(axis=1), 1.0, None)
    d_inv_sqrt = 1.0 / jnp.sqrt(deg)
    return adj * d_inv_sqrt[:, None] * d_inv_sqrt[None, :]


def gcn_forward(params, a_hat, inputs, *, tile=128):
    """conv1 -> relu -> conv3 -> relu -> conv4 -> relu -> conv2."""
    n = a_hat.shape[0]
    num_classes = params["conv2"]["w"].shape[1]
    n_p = _round_up(n, tile)

    # Pad + cast the N^2 normalized adjacency once (bf16 halves HBM traffic).
    a_p = jnp.pad(a_hat, ((0, n_p - n), (0, n_p - n))).astype(jnp.bfloat16)

    def pad_w(w):
        fi, fo = w.shape
        return jnp.pad(w, ((0, _round_up(fi, LANE) - fi),
                           (0, _round_up(fo, LANE) - fo))).astype(jnp.bfloat16)

    def pad_b(b):
        fo = b.shape[-1]
        return jnp.pad(b.reshape(1, fo),
                       ((0, 0), (0, _round_up(fo, LANE) - fo))
                       ).astype(jnp.float32)

    f_in = inputs.shape[1]
    h = jnp.pad(inputs, ((0, n_p - n), (0, _round_up(f_in, LANE) - f_in))
                ).astype(jnp.bfloat16)

    layer_order = ["conv1", "conv3", "conv4", "conv2"]
    for idx, name in enumerate(layer_order):
        last = idx == len(layer_order) - 1
        h = graph_conv_padded(
            a_p, h, pad_w(params[name]["w"]), pad_b(params[name]["b"]),
            apply_relu=not last,
            out_dtype=jnp.float32 if last else jnp.bfloat16,
            tile_m=tile, tile_k=tile)
    return h[:n, :num_classes]


# Pure-JAX reference that mirrors the kernel's bf16 casts (f32 accumulation).
def gcn_reference(params, a_hat, inputs):
    a32 = a_hat.astype(jnp.bfloat16).astype(jnp.float32)

    def layer(h32, name, relu):
        w = params[name]["w"].astype(jnp.bfloat16).astype(jnp.float32)
        b = params[name]["b"].astype(jnp.float32)
        xw = (h32 @ w).astype(jnp.bfloat16).astype(jnp.float32)
        out = a32 @ xw + b
        return jnp.maximum(out, 0.0) if relu else out

    def to_bf16(x):
        return x.astype(jnp.bfloat16).astype(jnp.float32)

    h = to_bf16(inputs)
    h = to_bf16(layer(h, "conv1", True))
    h = to_bf16(layer(h, "conv3", True))
    h = to_bf16(layer(h, "conv4", True))
    h = layer(h, "conv2", False)
    return h


if __name__ == "__main__":
    key = jax.random.PRNGKey(0)
    k_graph, k_feat, k_params = jax.random.split(key, 3)

    # Small synthetic graph: 256 nodes (exercises the 2x2 tiling),
    # 16 input feats, hidden=32, 8 classes.
    num_nodes, in_feats, hidden_size, num_classes = 256, 16, 32, 8

    # Random symmetric adjacency with self-loops (deterministic).
    rand = jax.random.uniform(k_graph, (num_nodes, num_nodes))
    adj = (rand < 0.05).astype(jnp.float32)
    adj = jnp.maximum(adj, adj.T)
    adj = jnp.maximum(adj, jnp.eye(num_nodes, dtype=jnp.float32))
    a_hat = normalize_adjacency(adj)

    inputs = jax.random.normal(k_feat, (num_nodes, in_feats), jnp.float32)
    params = init_gcn_params(k_params, in_feats, hidden_size, num_classes)

    out = gcn_forward(params, a_hat, inputs)
    out = jax.block_until_ready(out)

    ref = gcn_reference(params, a_hat, inputs)
    assert out.shape == (num_nodes, num_classes)
    assert jnp.allclose(out, ref, atol=2e-3, rtol=2e-3), float(
        jnp.max(jnp.abs(out - ref)))

    print("KERNEL_OK")
</pallas_src>

<mosaic_0001>
module attributes {stable_mosaic.version = 11 : i64} {
  func.func @_graph_conv_kernel(%arg0: i32, %arg1: i32, %arg2: memref<128x128xbf16, #tpu.memory_space<vmem>>, %arg3: memref<128x128xbf16, #tpu.memory_space<vmem>>, %arg4: memref<128x128xbf16, #tpu.memory_space<vmem>>, %arg5: memref<1x128xf32, #tpu.memory_space<vmem>>, %arg6: memref<128x128xbf16, #tpu.memory_space<vmem>>, %arg7: memref<128x128xf32, #tpu.memory_space<vmem>>) attributes {dimension_semantics = [#tpu.dimension_semantics<parallel>, #tpu.dimension_semantics<arbitrary>], iteration_bounds = array<i64: 2, 2>, scalar_prefetch = 0 : i64, scratch_operands = 1 : i64, tpu.core_type = #tpu.core_type<tc>, window_params = [{transform_indices = @transform_0, window_bounds = array<i64: 128, 128>}, {transform_indices = @transform_1, window_bounds = array<i64: 128, 128>}, {pipeline_mode = #tpu.pipeline_mode<synchronous>, transform_indices = @transform_2, window_bounds = array<i64: 128, 128>}, {pipeline_mode = #tpu.pipeline_mode<synchronous>, transform_indices = @transform_3, window_bounds = array<i64: 1, 128>}, {transform_indices = @transform_4, window_bounds = array<i64: 128, 128>}]} {
    %c0_i32 = arith.constant 0 : i32
    %0 = arith.cmpi eq, %arg1, %c0_i32 : i32
    %1 = arith.extui %0 : i1 to i32
    %c0_i32_0 = arith.constant 0 : i32
    %2 = arith.cmpi ne, %1, %c0_i32_0 : i32
    scf.if %2 {
      %cst_12 = arith.constant 0.000000e+00 : f32
      %15 = vector.broadcast %cst_12 : f32 to vector<128x128xf32>
      %c0_13 = arith.constant 0 : index
      %c0_14 = arith.constant 0 : index
      %16 = vector.load %arg7[%c0_13, %c0_14] : memref<128x128xf32, #tpu.memory_space<vmem>>, vector<128x128xf32>
      tpu.vector_store %arg7[%c0_13, %c0_14], %15 {strides = array<i32>} : memref<128x128xf32, #tpu.memory_space<vmem>>, vector<128x128xf32>,
    } else {
    }
    %c0 = arith.constant 0 : index
    %c0_1 = arith.constant 0 : index
    %3 = vector.load %arg3[%c0, %c0_1] : memref<128x128xbf16, #tpu.memory_space<vmem>>, vector<128x128xbf16>
    %c0_2 = arith.constant 0 : index
    %c0_3 = arith.constant 0 : index
    %4 = vector.load %arg4[%c0_2, %c0_3] : memref<128x128xbf16, #tpu.memory_space<vmem>>, vector<128x128xbf16>
    %cst = arith.constant dense<0.000000e+00> : vector<128x128xf32>
    %5 = tpu.matmul %3, %4, %cst {dimension_numbers = #tpu.dot_dimension_numbers<[1], [0], [0], [1], [0, 0, 1, 1], [], []>} : vector<128x128xbf16>, vector<128x128xbf16>, vector<128x128xf32> -> vector<128x128xf32>
    %c0_4 = arith.constant 0 : index
    %c0_5 = arith.constant 0 : index
    %6 = vector.load %arg7[%c0_4, %c0_5] : memref<128x128xf32, #tpu.memory_space<vmem>>, vector<128x128xf32>
    %c0_6 = arith.constant 0 : index
    %c0_7 = arith.constant 0 : index
    %7 = vector.load %arg2[%c0_6, %c0_7] : memref<128x128xbf16, #tpu.memory_space<vmem>>, vector<128x128xbf16>
    %8 = arith.truncf %5 : vector<128x128xf32> to vector<128x128xbf16>
    %cst_8 = arith.constant dense<0.000000e+00> : vector<128x128xf32>
    %9 = tpu.matmul %7, %8, %cst_8 {dimension_numbers = #tpu.dot_dimension_numbers<[1], [0], [0], [1], [0, 0, 1, 1], [], []>} : vector<128x128xbf16>, vector<128x128xbf16>, vector<128x128xf32> -> vector<128x128xf32>
    %10 = arith.addf %6, %9 : vector<128x128xf32>
    %c0_9 = arith.constant 0 : index
    %c0_10 = arith.constant 0 : index
    %11 = vector.load %arg7[%c0_9, %c0_10] : memref<128x128xf32, #tpu.memory_space<vmem>>, vector<128x128xf32>
    tpu.vector_store %arg7[%c0_9, %c0_10], %10 {strides = array<i32>} : memref<128x128xf32, #tpu.memory_space<vmem>>, vector<128x128xf32>,
    %c1_i32 = arith.constant 1 : i32
    %12 = arith.cmpi eq, %arg1, %c1_i32 : i32
    %13 = arith.extui %12 : i1 to i32
    %c0_i32_11 = arith.constant 0 : i32
    %14 = arith.cmpi ne, %13, %c0_i32_11 : i32
    scf.if %14 {
      %c0_12 = arith.constant 0 : index
      %c0_13 = arith.constant 0 : index
      %15 = vector.load %arg7[%c0_12, %c0_13] : memref<128x128xf32, #tpu.memory_space<vmem>>, vector<128x128xf32>
      %c0_14 = arith.constant 0 : index
      %c0_15 = arith.constant 0 : index
      %16 = vector.load %arg5[%c0_14, %c0_15] : memref<1x128xf32, #tpu.memory_space<vmem>>, vector<1x128xf32>
      %17 = vector.broadcast %16 : vector<1x128xf32> to vector<128x128xf32>
      %18 = arith.addf %15, %17 : vector<128x128xf32>
      %cst_16 = arith.constant 0.000000e+00 : f32
      %19 = vector.broadcast %cst_16 : f32 to vector<128x128xf32>
      %20 = arith.maximumf %18, %19 : vector<128x128xf32>
      %21 = arith.truncf %20 : vector<128x128xf32> to vector<128x128xbf16>
      %c0_17 = arith.constant 0 : index
      %c0_18 = arith.constant 0 : index
      %22 = vector.load %arg6[%c0_17, %c0_18] : memref<128x128xbf16, #tpu.memory_space<vmem>>, vector<128x128xbf16>
      tpu.vector_store %arg6[%c0_17, %c0_18], %21 {strides = array<i32>} : memref<128x128xbf16, #tpu.memory_space<vmem>>, vector<128x128xbf16>,
    } else {
    }
    return
  }
  func.func @transform_0(%arg0: i32, %arg1: i32) -> (i32, i32) {
    %c0_i32 = arith.constant 0 : i32
    return %arg0, %arg1 : i32, i32
  }
  func.func @transform_1(%arg0: i32, %arg1: i32) -> (i32, i32) {
    %c0_i32 = arith.constant 0 : i32
    %c0_i32_0 = arith.constant 0 : i32
    return %arg1, %c0_i32 : i32, i32
  }
  func.func @transform_2(%arg0: i32, %arg1: i32) -> (i32, i32) {
    %c0_i32 = arith.constant 0 : i32
    %c0_i32_0 = arith.constant 0 : i32
    %c0_i32_1 = arith.constant 0 : i32
    return %c0_i32, %c0_i32_0 : i32, i32
  }
  func.func @transform_3(%arg0: i32, %arg1: i32) -> (i32, i32) {
    %c0_i32 = arith.constant 0 : i32
    %c0_i32_0 = arith.constant 0 : i32
    %c0_i32_1 = arith.constant 0 : i32
    return %c0_i32, %c0_i32_0 : i32, i32
  }
  func.func @transform_4(%arg0: i32, %arg1: i32) -> (i32, i32) {
    %c0_i32 = arith.constant 0 : i32
    %c0_i32_0 = arith.constant 0 : i32
    return %arg0, %c0_i32 : i32, i32
  }
}

</mosaic_0001>

<bundles_post_ra>
// kernel: tpu_custom_call.1
= control target key start
LH: loop header
LB: loop body
LE: loop exit
PB: predicated region body
PF: predicated region fallthrough
CT: control target
= control target key end

     0   :  { %s1824_s0 = inlined_call_operand.hbm [shape: bf16[256,256], index: 0, kind: input, shape index: {}]   ;;  %s1825_s1 = inlined_call_operand.hbm [shape: bf16[256,128], index: 1, kind: input, shape index: {}]   ;;  %s1826_s2 = inlined_call_operand.hbm [shape: bf16[128,128], index: 2, kind: input, shape index: {}]   ;;  %s1827_s3 = inlined_call_operand.vmem [shape: f32[1,128], index: 3, kind: input, shape index: {}]   ;;  %s1828_s4 = inlined_call_operand.hbm [shape: bf16[256,128], index: 4, kind: output, shape index: {}]  }
   0x1   :  { %1843 = sst [smem:[#allocation25_spill]] %s1824_s0 }
   0x2   :  { %1844 = sst [smem:[#allocation26_spill]] %s1826_s2 }
   0x3   :  { %1845 = sst [smem:[#allocation27_spill]] %s1827_s3 }
   0x4   :  { %1846 = sst [smem:[#allocation28_spill]] %s1828_s4 }
   0x5   :  { %9 = vsyncpa [#allocation4], 0 }
   0x6   :  { %11 = vsyncpa [#allocation4 + $0x1], 0 }
   0x7   :  { %12 = vsyncpa [#allocation7], 0 }
   0x8   :  { %14 = vsyncpa [#allocation7 + $0x1], 0 }
   0x9   :  { %15 = vsyncpa [#allocation5], 0 }
   0xa   :  { %17 = vsyncpa [#allocation5 + $0x1], 0  ;;  %s1520_s15 = smov 0   ;;  %s1522_s16 = smov 0  }
   0xb   :  { %s1524_s17 = smov 0   ;;  %s1526_s18 = smov 0  }
   0xc   :  { %s1528_s19 = smov 0   ;;  %s1530_s20 = smov 0  }
   0xd   :  { %s1532_s21 = smov 0   ;;  %s1534_s22 = smov 0  }
   0xe   :  { %s1536_s23 = smov 0   ;;  %s1538_s24 = smov 0  }
   0xf   :  { %s1540_s25 = smov 0   ;;  %s1542_s26 = smov 0  }
  0x10   :  { %s1544_s27 = smov 0   ;;  %s1546_s28 = smov 0  }
  0x11 LB: > { %1847 = sst [smem:[#allocation14_spill]] %s1434_s15  ;;  %s1587_s29 = sadd.s32 4294967295, %s1486_s28   ;;  %s1486_s28 = sphi %s1546_s28, %s23_s28   ;;  %s1482_s27 = sphi %s1544_s27, %s1893_s27   ;;  %s1478_s26 = sphi %s1542_s26, %s1892_s26   ;;  %s1474_s25 = sphi %s1540_s25, %s1891_s25   ;;  %s1470_s24 = sphi %s1538_s24, %s1890_s24   ;;  %s1466_s23 = sphi %s1536_s23, %s1878_s23   ;;  %s1462_s22 = sphi %s1534_s22, %s1889_s22   ;;  %s1458_s21 = sphi %s1532_s21, %s1888_s21   ;;  %s1454_s20 = sphi %s1530_s20, %s1887_s20   ;;  %s1450_s19 = sphi %s1528_s19, %s1886_s19   ;;  %s1446_s18 = sphi %s1526_s18, %s1885_s18   ;;  %s1442_s17 = sphi %s1524_s17, %s1876_s17   ;;  %s1438_s16 = sphi %s1522_s16, %s1884_s16   ;;  %s1434_s15 = sphi %s1520_s15, %s1883_s15  }
  0x12   : > { %1848 = sst [smem:[#allocation15_spill]] %s1442_s17  ;;  %s884_s30 = sadd.s32 4294967294, %s1486_s28  }
  0x13   : > { %1849 = sst [smem:[#allocation16_spill]] %s1466_s23  ;;  %p57_p0 = scmp.ne.s32.totalorder %s1462_s22, %s1458_s21 }
  0x14   : > { %1850 = sst [smem:[#allocation17_spill]] %s1474_s25  ;;  %p58_p1 = scmp.eq.s32.totalorder %s1587_s29, 0 }
  0x15   : > { %1851 = sst [smem:[#allocation18_spill]] %s1482_s27  ;;  %p83_p2 = scmp.ne.s32.totalorder %s1450_s19, %s1446_s18 }
  0x16   : > { %p148_p3 = scmp.ne.s32.totalorder %s1442_s17, %s1438_s16  ;;  %p1597_p4 = por %p58_p1, %p57_p0 }
  0x17   : > { %p149_p5 = scmp.eq.s32.totalorder %s1587_s29, 3  ;;  %p1604_p6 = por %p83_p2, %p58_p1 }
  0x18   : > { %p154_p7 = scmp.ne.s32.totalorder %s1438_s16, %s1434_s15  ;;  %p155_p9 = scmp.eq.s32.totalorder %s884_s30, 3 }
  0x19   : > { %p1610_p8 = por %p149_p5, %p148_p3  ;;  %p885_p10 = scmp.ge.s32.totalorder %s1486_s28, 1 }
  0x1a   : > { %p162_p11 = scmp.lt.s32.totalorder %s1486_s28, 5  ;;  %p1616_p12 = por %p155_p9, %p154_p7 }
  0x1b   : > { %s1854_s7 = scalar_select %p1610_p8, 1, 0 }
  0x1c   : > { %s1856_s8 = scalar_select %p1616_p12, 1, 0 }
  0x1d   : > { %1855 = sst [smem:[#allocation19_spill]] %s1854_s7  ;;  %p1620_p13 = pnand %p885_p10, %p162_p11 }
  0x1e   : > { %1857 = sst [smem:[#allocation20_spill]] %s1856_s8  ;;  %s1488_s13 = smov [#allocation8]  }
  0x1f   : > { %s1859_s2 = sld [smem:[#allocation26_spill]]  ;;  %p1103_p0 = pneg %p1620_p13 }
  0x20   : > { %s175_s14 = sshll.u32 %s1488_s13, 4  ;;  %s1829_s18 = smov 64   ;;  %s176_s14 = int_to_ptr.vmem [resolvable:$true] %s175_s14 }
  0x21   : > { %p1104_p2 = pnand %p1103_p0, %p58_p1  ;;  %s1831_s21 = smov 4  }
  0x22   : > { %s32_s30 = sadd.s32 1, %s1478_s26  ;;  %s35_s10 = sadd.s32 1, %s1482_s27 }
  0x23   : > { %p33_p3 = scmp.ge.s32.totalorder %s32_s30, 2  ;;  %s44_s11 = sadd.s32 1, %s1466_s23 }
  0x24   : > { %p51_p5 = scmp.ne.s32.totalorder %s1466_s23, %s1462_s22  ;;  %p52_p7 = scmp.eq.s32.totalorder %s1486_s28, 0 }
  0x25   : > { %s173_s12 = sshll.u32 %s1859_s2, 4  ;;  %s1895_s30 = smov (%p33_p3, %s32_s30), 0  ;;  %s174_s12 = int_to_ptr.hbm [resolvable:$true] %s173_s12 }
  0x26   : > { %1106 = dma.hbm_to_vmem [thread:$0]  (!%p1104_p2), %s174_s12, 1024, %s176_s14, [#allocation7], %s1829_s18, %s1829_s18, %s1831_s21  }
  0x27   : > { %1860 = sst [smem:[#allocation21_spill]] %s1895_s30  ;;  %s1897_s10 = smov (!%p33_p3, %s35_s10), %s1482_s27 }
  0x28   : > { %s1645_s13 = ssub.s32 %s1478_s26, %s1895_s30  ;;  %p1649_p9 = por %p52_p7, %p51_p5 }
  0x29   : > { %p37_p10 = scmp.ge.s32.totalorder %s1897_s10, 2  ;;  %p68_p11 = scmp.eq.s32.totalorder %s1645_s13, 0 }
  0x2a   : > { %s138_s14 = sadd.s32 1, %s1442_s17  ;;  %p1119_p0 = scmp.lt.s32.totalorder %s1486_s28, 4 }
  0x2b   : > { %s1899_s10 = smov (%p37_p10, %s1897_s10), 0  ;;  %s192_s18 = sand.u32 1, %s1466_s23  }
  0x2c   : > { %1862 = sst [smem:[#allocation22_spill]] %s1899_s10  ;;  %s1003_s21 = sshll.u32 %s1482_s27, 5 }
  0x2d   : > { %s39_s2 = ssub.s32 %s1482_s27, %s1899_s10  ;;  %s888_s8 = sshll.u32 %s192_s18, 6 }
  0x2e   : > { %s41_s30 = sor.u32 %s1645_s13, %s39_s2  ;;  %p136_p2 = scmp.eq.s32.totalorder %s39_s2, 0 }
  0x2f   : > { %p42_p3 = scmp.eq.s32.totalorder %s41_s30, 0  ;;  %s201_s7 = sadd.s32 %s1478_s26, %s1003_s21 }
  0x30   : > { %s1664_s15 = scalar_select %p136_p2, %s1442_s17, %s138_s14  }
  0x31   : > { %s1667_s4 = scalar_select %p42_p3, %s1466_s23, %s44_s11  }
  0x32   : > { %1863 = sst [smem:[#allocation23_spill]] %s1664_s15  ;;  %s891_s25 = sshll.u32 %s201_s7, 2 }
  0x33   : > { %1864 = sst [smem:[#allocation24_spill]] %s1667_s4  ;;  %s196_s3 = scalar_lea.vmem [#allocation3], %s888_s8 }
  0x34   : > { %s206_s10 = sshll.u32 %s196_s3, 4  ;;  %s1865_s0 = sld [smem:[#allocation25_spill]]  ;;  %s207_s10 = int_to_ptr.vmem [resolvable:$true] %s206_s10 }
  0x35   : > { %p1108_p5 = pnand %p1119_p0, %p1649_p9  ;;  %s193_s11 = scalar_lea.sflag [#allocation4], %s192_s18 }
  0x36   : > { %s1491_s4 = smov 128   ;;  %s1866_s23 = smov 4  }
  0x37   : > { %s1867_s21 = smov 64   ;;  %s216_s7 = sand.u32 1, %s1486_s28  }
  0x38   : > { %s70_s8 = sadd.s32 1, %s1454_s20  ;;  %p77_p10 = scmp.ne.s32.totalorder %s1454_s20, %s1450_s19 }
  0x39   : > { %s1686_s3 = scalar_select %p68_p11, %s1454_s20, %s70_s8  }
  0x3a   : > { %s203_s27 = scalar_lea.hbm %s1865_s0, %s891_s25  ;;  %p79_p2 = por %p77_p10, %p52_p7 }
  0x3b   : > { %s204_s14 = sshll.u32 %s203_s27, 4  ;;  %s218_s25 = sand.u32 1, %s1454_s20   ;;  %s205_s14 = int_to_ptr.hbm [resolvable:$true] %s204_s14 }
  0x3c   : > { %1110 = dma.hbm_to_vmem [thread:$0]  (!%p1108_p5), %s205_s14, 1024, %s207_s10, %s193_s11, %s1491_s4, %s1867_s21, %s1866_s23  }
  0x3d   : > { %s1004_s27 = sshll.u32 %s1478_s26, 6  ;;  %s892_s12 = sshll.u32 %s218_s25, 6 }
  0x3e   : > { %s225_s18 = scalar_lea.hbm %s1825_s1, %s1004_s27  ;;  %s220_s15 = scalar_lea.vmem [#allocation6], %s892_s12 }
  0x3f   : > { %s226_s0 = sshll.u32 %s225_s18, 4  ;;  %s228_s17 = sshll.u32 %s220_s15, 4  ;;  %s227_s0 = int_to_ptr.hbm [resolvable:$true] %s226_s0  ;;  %s229_s17 = int_to_ptr.vmem [resolvable:$true] %s228_s17 }
  0x40   : > { %p1111_p9 = pnand %p1119_p0, %p79_p2  ;;  %s217_s4 = scalar_lea.sflag [#allocation7], %s216_s7 }
  0x41   : > { %240 = sbr.rel (%p1620_p13) target bundleno = 583 (0x247), region = 36  ;;  %s242_s10 = sand.u32 (!%p1620_p13), 1, %s1462_s22  }
  0x42   : > { %1113 = dma.hbm_to_vmem [thread:$0]  (!%p1111_p9), %s227_s0, 1024, %s229_s17, %s217_s4, %s1867_s21, %s1867_s21, %s1866_s23  }
  0x43   : > { %s896_s13 = sshll.u32 (!%p1620_p13), %s242_s10, 6  ;;  %s243_s14 = scalar_lea.sflag (!%p1620_p13), [#allocation4], %s242_s10 }
  0x44   : > { %s1703_s11 = scalar_lea.vmem (!%p1620_p13), [#allocation3], %s896_s13 }
  0x46   : > { %1417 = dma.done.wait (%p1597_p4), %s243_s14, 1024  }
  0x47   : > { %1419 = vsyncadd (%p1597_p4), %s243_s14, 4294966272  ;;  %s252_s15 = sand.u32 1, %s1587_s29   ;;  %s254_s0 = sand.u32 1, %s1450_s19  }
  0x48   : > { %s897_s17 = sshll.u32 %s254_s0, 6  ;;  %s253_s23 = scalar_lea.sflag [#allocation7], %s252_s15 }
  0x49   : > { %s1711_s9 = scalar_lea.vmem [#allocation6], %s897_s17 }
  0x4a   : > { %1421 = dma.done.wait (%p1604_p6), %s253_s23, 1024  }
  0x4b   : > { %1423 = vsyncadd (%p1604_p6), %s253_s23, 4294966272 }
  0x4c   : > { %1425 = dma.done.wait (%p58_p1), [#allocation7], 1024  }
  0x4d   : > { %1427 = vsyncadd (%p58_p1), [#allocation7], 4294966272  ;;  %s289_s5 = sand.u32 1, %s1438_s16   ;;  %p900_p4 = scmp.ne.s32.totalorder %s1470_s24, 0 }
  0x4e   : > { %s899_s21 = sshll.u32 %s289_s5, 6 }
  0x4f   : > { %s1724_s7 = scalar_lea.vmem [#allocation9], %s899_s21  ;;  %298 = sbr.rel (%p900_p4) target bundleno = 101 (0x65), region = 52 }
  0x54   : > { %v1492_v0 = vmov 0.0  }
  0x55   : > { %299 = vst [vmem:[#allocation2 + $0x30] sm:$0xff] %v1492_v0 }
  0x56   : > { %300 = vst [vmem:[#allocation2] sm:$0xff] %v1492_v0 }
  0x57   : > { %301 = vst [vmem:[#allocation2 + $0x58] sm:$0xff] %v1492_v0 }
  0x58   : > { %302 = vst [vmem:[#allocation2 + $0x18] sm:$0xff] %v1492_v0 }
  0x59   : > { %303 = vst [vmem:[#allocation2 + $0x50] sm:$0xff] %v1492_v0 }
  0x5a   : > { %304 = vst [vmem:[#allocation2 + $0x68] sm:$0xff] %v1492_v0 }
  0x5b   : > { %305 = vst [vmem:[#allocation2 + $0x8] sm:$0xff] %v1492_v0 }
  0x5c   : > { %306 = vst [vmem:[#allocation2 + $0x48] sm:$0xff] %v1492_v0 }
  0x5d   : > { %307 = vst [vmem:[#allocation2 + $0x40] sm:$0xff] %v1492_v0 }
  0x5e   : > { %308 = vst [vmem:[#allocation2 + $0x20] sm:$0xff] %v1492_v0 }
  0x5f   : > { %309 = vst [vmem:[#allocation2 + $0x10] sm:$0xff] %v1492_v0 }
  0x60   : > { %310 = vst [vmem:[#allocation2 + $0x38] sm:$0xff] %v1492_v0 }
  0x61   : > { %311 = vst [vmem:[#allocation2 + $0x60] sm:$0xff] %v1492_v0 }
  0x62   : > { %312 = vst [vmem:[#allocation2 + $0x70] sm:$0xff] %v1492_v0 }
  0x63   : > { %313 = vst [vmem:[#allocation2 + $0x78] sm:$0xff] %v1492_v0 }
  0x64   : > { %314 = vst [vmem:[#allocation2 + $0x28] sm:$0xff] %v1492_v0 }
  0x65 PF: > { %v1020_v1 = vld [vmem:[#allocation8 + $0x38] sm:$0xff]  ;;  %v1019_v2 = vld [vmem:[#allocation8 + $0x30] sm:$0xff]  ;;  %v1018_v3 = vld [vmem:[#allocation8 + $0x28] sm:$0xff]  ;;  %p997_p1 = scmp.ne.s32.totalorder %s1470_s24, 1 }
  0x66   : > { %1077 = vmatpush.bf16.msra.mxu2 %v1020_v1  ;;  %443 = vmatpush.bf16.msra.mxu0 %v1020_v1  ;;  %v1017_v4 = vld [vmem:[#allocation8 + $0x20] sm:$0xff]  ;;  %v1016_v5 = vld [vmem:[#allocation8 + $0x18] sm:$0xff]  ;;  %v1015_v6 = vld [vmem:[#allocation8 + $0x10] sm:$0xff]  ;;  %s1868_s8 = sld [smem:[#allocation27_spill]] (!%p997_p1) }
  0x67   : > { %v1014_v7 = vld [vmem:[#allocation8 + $0x8] sm:$0xff]  ;;  %v1013_v8 = vld [vmem:[#allocation8] sm:$0xff]  ;;  %v1011_v13 = vld [vmem:[%s1711_s9 + $0x30] sm:$0xff] }
  0x68   : > { %v1009_v9 = vld [vmem:[%s1711_s9 + $0x20] sm:$0xff]  ;;  %v1010_v11 = vld [vmem:[%s1711_s9 + $0x28] sm:$0xff]  ;;  %v1007_v14 = vld [vmem:[%s1711_s9 + $0x10] sm:$0xff] }
  0x69   : > { %v1005_v10 = vld [vmem:[%s1711_s9] sm:$0xff]  ;;  %v1006_v12 = vld [vmem:[%s1711_s9 + $0x8] sm:$0xff]  ;;  %v1012_v15 = vld [vmem:[%s1711_s9 + $0x38] sm:$0xff] }
  0x6a   : > { %1078 = vmatpush.bf16.msra.mxu2 %v1019_v2  ;;  %444 = vmatpush.bf16.msra.mxu0 %v1019_v2  ;;  %v1008_v16 = vld [vmem:[%s1711_s9 + $0x18] sm:$0xff]  ;;  %v1021_v41 = vld [vmem:[%s1703_s11] sm:$0xff]  ;;  %v1022_v43 = vld [vmem:[%s1703_s11 + $0x8] sm:$0xff] }
  0x6b   : > { %v1025_v42 = vld [vmem:[%s1703_s11 + $0x20] sm:$0xff]  ;;  %v1026_v44 = vld [vmem:[%s1703_s11 + $0x28] sm:$0xff]  ;;  %v1023_v45 = vld [vmem:[%s1703_s11 + $0x10] sm:$0xff] }
  0x6c   : > { %v1027_v46 = vld [vmem:[%s1703_s11 + $0x30] sm:$0xff]  ;;  %v1024_v47 = vld [vmem:[%s1703_s11 + $0x18] sm:$0xff]  ;;  %v500_v52 = vld [vmem:[#allocation2 + $0x40] sm:$0xff] }
  0x6d   : > { %v1028_v48 = vld [vmem:[%s1703_s11 + $0x38] sm:$0xff]  ;;  %v492_v49 = vld [vmem:[#allocation2 + $0x30] sm:$0xff]  ;;  %v493_v54 = vld [vmem:[#allocation2] sm:$0xff] }
  0x6e   : > { %1079 = vmatpush.bf16.msra.mxu2 %v1018_v3  ;;  %445 = vmatpush.bf16.msra.mxu0 %v1018_v3  ;;  %v501_v58 = vld [vmem:[#allocation2 + $0x20] sm:$0xff]  ;;  %v494_v60 = vld [vmem:[#allocation2 + $0x58] sm:$0xff]  ;;  %v502_v0 = vld [vmem:[#allocation2 + $0x10] sm:$0xff] }
  0x6f   : > { %v495_v2 = vld [vmem:[#allocation2 + $0x18] sm:$0xff] }
  0x72   : > { %1080 = vmatpush.bf16.msra.mxu2 %v1017_v4  ;;  %446 = vmatpush.bf16.msra.mxu0 %v1017_v4 }
  0x76   : > { %1081 = vmatpush.bf16.msra.mxu2 %v1016_v5  ;;  %447 = vmatpush.bf16.msra.mxu0 %v1016_v5 }
  0x7a   : > { %1082 = vmatpush.bf16.msra.mxu2 %v1015_v6  ;;  %448 = vmatpush.bf16.msra.mxu0 %v1015_v6  ;;  %v503_v6 = vld [vmem:[#allocation2 + $0x38] sm:$0xff] }
  0x7e   : > { %1083 = vmatpush.bf16.msra.mxu2 %v1014_v7  ;;  %449 = vmatpush.bf16.msra.mxu0 %v1014_v7 }
  0x82   : > { %1084 = vmatpush.bf16.msra.mxu2 %v1013_v8  ;;  %450 = vmatpush.bf16.msra.mxu0 %v1013_v8  ;;  %v496_v8 = vld [vmem:[#allocation2 + $0x50] sm:$0xff] }
  0x85   : > { %471 = vmatmul.bf16.vlgmr.msra.gmra.mxu2 %v1009_v9  ;;  %451 = vmatmul.bf16.vlgmr.msra.gmra.mxu0 %v1005_v10 }
  0x95   : > { %476 = vmatmul.bf16.gmra.mxu2 %v1010_v11  ;;  %456 = vmatmul.bf16.gmra.mxu0 %v1006_v12  ;;  %v504_v12 = vld [vmem:[#allocation2 + $0x60] sm:$0xff] }
  0xa5   : > { %481 = vmatmul.bf16.gmra.mxu2 %v1011_v13  ;;  %461 = vmatmul.bf16.gmra.mxu0 %v1007_v14  ;;  %v497_v14 = vld [vmem:[#allocation2 + $0x68] sm:$0xff] }
  0xb5   : > { %486 = vmatmul.bf16.gmra.mxu2 %v1012_v15  ;;  %466 = vmatmul.bf16.gmra.mxu0 %v1008_v16 }
 0x102   : > { %v452_v18 = vpop.f32.mrf.mxu0 }
 0x108   : > { %v472_v17 = vpop.f32.mrf.mxu2 }
 0x10a   : > { %v454_v20 = vpop.f32.mrf.mxu0 }
 0x10b   : > { %v524_v40 = vpack.c.bf16 %v454_v20, %v452_v18  ;;  %v505_v18 = vld [vmem:[#allocation2 + $0x70] sm:$0xff]  ;;  %v498_v20 = vld [vmem:[#allocation2 + $0x8] sm:$0xff] }
 0x110   : > { %v474_v19 = vpop.f32.mrf.mxu2 }
 0x111   : > { %v528_v35 = vpack.c.bf16 %v474_v19, %v472_v17 }
 0x112   : > { %v457_v22 = vpop.f32.mrf.mxu0 }
 0x118   : > { %v477_v21 = vpop.f32.mrf.mxu2 }
 0x11a   : > { %v459_v24 = vpop.f32.mrf.mxu0 }
 0x11b   : > { %v525_v39 = vpack.c.bf16 %v459_v24, %v457_v22  ;;  %v506_v24 = vld [vmem:[#allocation2 + $0x78] sm:$0xff] }
 0x120   : > { %v479_v23 = vpop.f32.mrf.mxu2 }
 0x121   : > { %v529_v34 = vpack.c.bf16 %v479_v23, %v477_v21 }
 0x122   : > { %v462_v26 = vpop.f32.mrf.mxu0 }
 0x128   : > { %v482_v25 = vpop.f32.mrf.mxu2 }
 0x12a   : > { %v464_v29 = vpop.f32.mrf.mxu0 }
 0x12b   : > { %v526_v38 = vpack.c.bf16 %v464_v29, %v462_v26  ;;  %v499_v26 = vld [vmem:[#allocation2 + $0x48] sm:$0xff] }
 0x130   : > { %v484_v27 = vpop.f32.mrf.mxu2 }
 0x131   : > { %v530_v33 = vpack.c.bf16 %v484_v27, %v482_v25 }
 0x132   : > { %v467_v32 = vpop.f32.mrf.mxu0 }
 0x138   : > { %v487_v28 = vpop.f32.mrf.mxu2 }
 0x13a   : > { %v469_v36 = vpop.f32.mrf.mxu0 }
 0x13b   : > { %v527_v37 = vpack.c.bf16 %v469_v36, %v467_v32 }
 0x140   : > { %v489_v30 = vpop.f32.mrf.mxu2 }
 0x141   : > { %v531_v31 = vpack.c.bf16 %v489_v30, %v487_v28  ;;  %v507_v30 = vld [vmem:[#allocation2 + $0x28] sm:$0xff] }
 0x143   : > { %580 = vmatpush.bf16.msra.mxu1 %v531_v31  ;;  %1085 = vmatpush.bf16.msra.mxu3 %v531_v31 }
 0x147   : > { %581 = vmatpush.bf16.msra.mxu1 %v530_v33  ;;  %1086 = vmatpush.bf16.msra.mxu3 %v530_v33 }
 0x14b   : > { %582 = vmatpush.bf16.msra.mxu1 %v529_v34  ;;  %1087 = vmatpush.bf16.msra.mxu3 %v529_v34 }
 0x14f   : > { %583 = vmatpush.bf16.msra.mxu1 %v528_v35  ;;  %1088 = vmatpush.bf16.msra.mxu3 %v528_v35 }
 0x153   : > { %584 = vmatpush.bf16.msra.mxu1 %v527_v37  ;;  %1089 = vmatpush.bf16.msra.mxu3 %v527_v37 }
 0x157   : > { %585 = vmatpush.bf16.msra.mxu1 %v526_v38  ;;  %1090 = vmatpush.bf16.msra.mxu3 %v526_v38 }
 0x15b   : > { %586 = vmatpush.bf16.msra.mxu1 %v525_v39  ;;  %1091 = vmatpush.bf16.msra.mxu3 %v525_v39 }
 0x15f   : > { %587 = vmatpush.bf16.msra.mxu1 %v524_v40  ;;  %1092 = vmatpush.bf16.msra.mxu3 %v524_v40 }
 0x162   : > { %588 = vmatmul.bf16.vlgmr.msra.gmra.mxu1 %v1021_v41  ;;  %608 = vmatmul.bf16.vlgmr.msra.gmra.mxu3 %v1025_v42 }
 0x172   : > { %593 = vmatmul.bf16.gmra.mxu1 %v1022_v43  ;;  %613 = vmatmul.bf16.gmra.mxu3 %v1026_v44 }
 0x182   : > { %598 = vmatmul.bf16.gmra.mxu1 %v1023_v45  ;;  %618 = vmatmul.bf16.gmra.mxu3 %v1027_v46 }
 0x192   : > { %603 = vmatmul.bf16.gmra.mxu1 %v1024_v47  ;;  %623 = vmatmul.bf16.gmra.mxu3 %v1028_v48 }
 0x1df   : > { %v589_v50 = vpop.f32.mrf.mxu1 }
 0x1e0   : > { %v629_v51 = vadd.f32 %v589_v50, %v492_v49 }
 0x1e2   : > { %645 = vst [vmem:[#allocation2 + $0x30] sm:$0xff] %v629_v51 }
 0x1e5   : > { %v609_v53 = vpop.f32.mrf.mxu3 }
 0x1e6   : > { %v637_v55 = vadd.f32 %v609_v53, %v500_v52 }
 0x1e7   : > { %v591_v56 = vpop.f32.mrf.mxu1 }
 0x1e8   : > { %653 = vst [vmem:[#allocation2 + $0x40] sm:$0xff] %v637_v55  ;;  %v630_v57 = vadd.f32 %v591_v56, %v493_v54 }
 0x1ea   : > { %646 = vst [vmem:[#allocation2] sm:$0xff] %v630_v57 }
 0x1ed   : > { %v611_v59 = vpop.f32.mrf.mxu3 }
 0x1ee   : > { %v638_v61 = vadd.f32 %v611_v59, %v501_v58 }
 0x1ef   : > { %v594_v62 = vpop.f32.mrf.mxu1 }
 0x1f0   : > { %654 = vst [vmem:[#allocation2 + $0x20] sm:$0xff] %v638_v61  ;;  %v631_v63 = vadd.f32 %v594_v62, %v494_v60 }
 0x1f2   : > { %647 = vst [vmem:[#allocation2 + $0x58] sm:$0xff] %v631_v63 }
 0x1f5   : > { %v614_v1 = vpop.f32.mrf.mxu3 }
 0x1f6   : > { %v639_v3 = vadd.f32 %v614_v1, %v502_v0 }
 0x1f7   : > { %v596_v4 = vpop.f32.mrf.mxu1 }
 0x1f8   : > { %655 = vst [vmem:[#allocation2 + $0x10] sm:$0xff] %v639_v3  ;;  %v632_v5 = vadd.f32 %v596_v4, %v495_v2 }
 0x1fa   : > { %648 = vst [vmem:[#allocation2 + $0x18] sm:$0xff] %v632_v5 }
 0x1fd   : > { %v616_v7 = vpop.f32.mrf.mxu3 }
 0x1fe   : > { %v640_v9 = vadd.f32 %v616_v7, %v503_v6 }
 0x1ff   : > { %v599_v10 = vpop.f32.mrf.mxu1 }
 0x200   : > { %656 = vst [vmem:[#allocation2 + $0x38] sm:$0xff] %v640_v9  ;;  %v633_v11 = vadd.f32 %v599_v10, %v496_v8 }
 0x202   : > { %649 = vst [vmem:[#allocation2 + $0x50] sm:$0xff] %v633_v11 }
 0x205   : > { %v619_v13 = vpop.f32.mrf.mxu3 }
 0x206   : > { %v641_v15 = vadd.f32 %v619_v13, %v504_v12 }
 0x207   : > { %v601_v16 = vpop.f32.mrf.mxu1 }
 0x208   : > { %657 = vst [vmem:[#allocation2 + $0x60] sm:$0xff] %v641_v15  ;;  %v634_v17 = vadd.f32 %v601_v16, %v497_v14 }
 0x20a   : > { %650 = vst [vmem:[#allocation2 + $0x68] sm:$0xff] %v634_v17 }
 0x20d   : > { %v621_v19 = vpop.f32.mrf.mxu3 }
 0x20e   : > { %v642_v21 = vadd.f32 %v621_v19, %v505_v18 }
 0x20f   : > { %v604_v22 = vpop.f32.mrf.mxu1 }
 0x210   : > { %658 = vst [vmem:[#allocation2 + $0x70] sm:$0xff] %v642_v21  ;;  %v635_v23 = vadd.f32 %v604_v22, %v498_v20 }
 0x212   : > { %651 = vst [vmem:[#allocation2 + $0x8] sm:$0xff] %v635_v23 }
 0x215   : > { %v624_v25 = vpop.f32.mrf.mxu3 }
 0x216   : > { %v643_v27 = vadd.f32 %v624_v25, %v506_v24 }
 0x217   : > { %v606_v28 = vpop.f32.mrf.mxu1 }
 0x218   : > { %659 = vst [vmem:[#allocation2 + $0x78] sm:$0xff] %v643_v27  ;;  %v636_v29 = vadd.f32 %v606_v28, %v499_v26 }
 0x21a   : > { %652 = vst [vmem:[#allocation2 + $0x48] sm:$0xff] %v636_v29 }
 0x21c   : > { %664 = sbr.rel (%p997_p1) target bundleno = 561 (0x231), region = 56 }
 0x21d   : > { %v626_v31 = vpop.f32.mrf.mxu3 }
 0x21e   : > { %v644_v32 = vadd.f32 %v626_v31, %v507_v30 }
 0x220   : > { %660 = vst [vmem:[#allocation2 + $0x28] sm:$0xff] %v644_v32 }
 0x221   : > { %v665_v33 = vld [vmem:[#allocation2 + $0x30] sm:$0xff]  ;;  %v666_v34 = vld [vmem:[#allocation2] sm:$0xff]  ;;  %v667_v36 = vld [vmem:[#allocation2 + $0x58] sm:$0xff] }
 0x222   : > { %v1241_v35 = vld [vmem:[%s1868_s8] ss:$0 sm:$0xff]  ;;  %v668_v37 = vld [vmem:[#allocation2 + $0x18] sm:$0xff]  ;;  %v669_v38 = vld [vmem:[#allocation2 + $0x50] sm:$0xff] }
 0x223   : > { %v670_v39 = vld [vmem:[#allocation2 + $0x68] sm:$0xff]  ;;  %v685_v41 = vadd.f32 %v1241_v35, %v665_v33  ;;  %v686_v42 = vadd.f32 %v1241_v35, %v666_v34  ;;  %v687_v43 = vadd.f32 %v1241_v35, %v667_v36  ;;  %v688_v44 = vadd.f32 %v1241_v35, %v668_v37  ;;  %v673_v50 = vld [vmem:[#allocation2 + $0x40] sm:$0xff]  ;;  %v675_v56 = vld [vmem:[#allocation2 + $0x10] sm:$0xff] }
 0x224   : > { %v671_v40 = vld [vmem:[#allocation2 + $0x8] sm:$0xff]  ;;  %v689_v46 = vadd.f32 %v1241_v35, %v669_v38  ;;  %v690_v47 = vadd.f32 %v1241_v35, %v670_v39  ;;  %v674_v51 = vld [vmem:[#allocation2 + $0x20] sm:$0xff]  ;;  %v676_v57 = vld [vmem:[#allocation2 + $0x38] sm:$0xff]  ;;  %v693_v2 = vadd.f32 %v1241_v35, %v673_v50  ;;  %v695_v8 = vadd.f32 %v1241_v35, %v675_v56 }
 0x225   : > { %v672_v45 = vld [vmem:[#allocation2 + $0x48] sm:$0xff]  ;;  %v691_v48 = vadd.f32 %v1241_v35, %v671_v40  ;;  %v701_v52 = vmax.f32 %v685_v41, 0.0  ;;  %v702_v53 = vmax.f32 %v686_v42, 0.0  ;;  %v703_v54 = vmax.f32 %v687_v43, 0.0  ;;  %v677_v62 = vld [vmem:[#allocation2 + $0x60] sm:$0xff]  ;;  %v678_v63 = vld [vmem:[#allocation2 + $0x70] sm:$0xff] }
 0x226   : > { %v692_v49 = vadd.f32 %v1241_v35, %v672_v45  ;;  %v704_v55 = vmax.f32 %v688_v44, 0.0  ;;  %v705_v58 = vmax.f32 %v689_v46, 0.0  ;;  %v706_v59 = vmax.f32 %v690_v47, 0.0  ;;  %v679_v4 = vld [vmem:[#allocation2 + $0x78] sm:$0xff] }
 0x227   : > { %v707_v60 = vmax.f32 %v691_v48, 0.0  ;;  %v1033_v0 = vpack.c.bf16 %v702_v53, %v701_v52  ;;  %v694_v3 = vadd.f32 %v1241_v35, %v674_v51  ;;  %v680_v5 = vld [vmem:[#allocation2 + $0x28] sm:$0xff]  ;;  %v696_v9 = vadd.f32 %v1241_v35, %v676_v57 }
 0x228   : > { %v708_v61 = vmax.f32 %v692_v49, 0.0  ;;  %v1038_v1 = vpack.c.bf16 %v704_v55, %v703_v54  ;;  %v1043_v6 = vpack.c.bf16 %v706_v59, %v705_v58  ;;  %v709_v10 = vmax.f32 %v693_v2, 0.0 }
 0x229   : > { %1034 = vst [vmem:[%s1724_s7] sm:$0xff] %v1033_v0   ;;  %v710_v11 = vmax.f32 %v694_v3, 0.0  ;;  %v697_v12 = vadd.f32 %v1241_v35, %v677_v62  ;;  %v698_v13 = vadd.f32 %v1241_v35, %v678_v63  ;;  %v711_v14 = vmax.f32 %v695_v8, 0.0 }
 0x22a   : > { %v1048_v7 = vpack.c.bf16 %v708_v61, %v707_v60  ;;  %1070 = vst [vmem:[%s1724_s7 + $0x8] sm:$0xff] %v1038_v1   ;;  %v712_v15 = vmax.f32 %v696_v9, 0.0  ;;  %v699_v16 = vadd.f32 %v1241_v35, %v679_v4  ;;  %v700_v17 = vadd.f32 %v1241_v35, %v680_v5 }
 0x22b   : > { %1071 = vst [vmem:[%s1724_s7 + $0x10] sm:$0xff] %v1043_v6   ;;  %v1053_v18 = vpack.c.bf16 %v710_v11, %v709_v10  ;;  %v713_v19 = vmax.f32 %v697_v12, 0.0  ;;  %v714_v20 = vmax.f32 %v698_v13, 0.0 }
 0x22c   : > { %1072 = vst [vmem:[%s1724_s7 + $0x18] sm:$0xff] %v1048_v7   ;;  %v1058_v21 = vpack.c.bf16 %v712_v15, %v711_v14  ;;  %v715_v22 = vmax.f32 %v699_v16, 0.0  ;;  %v716_v23 = vmax.f32 %v700_v17, 0.0 }
 0x22d   : > { %1073 = vst [vmem:[%s1724_s7 + $0x20] sm:$0xff] %v1053_v18   ;;  %v1063_v24 = vpack.c.bf16 %v714_v20, %v713_v19 }
 0x22e   : > { %1074 = vst [vmem:[%s1724_s7 + $0x28] sm:$0xff] %v1058_v21   ;;  %v1068_v25 = vpack.c.bf16 %v716_v23, %v715_v22 }
 0x22f   : > { %1075 = vst [vmem:[%s1724_s7 + $0x30] sm:$0xff] %v1063_v24  }
 0x230   : > { %1076 = vst [vmem:[%s1724_s7 + $0x38] sm:$0xff] %v1068_v25  }
 0x231 PF: > { %s1869_s24 = sld [smem:[#allocation17_spill]]  ;;  %s762_s4 = sshll.u32 %s1724_s7, 4  ;;  %s763_s4 = int_to_ptr.vmem [resolvable:$true] %s762_s4 }
 0x232   : > { %s1871_s30 = sld [smem:[#allocation28_spill]]  ;;  %s750_s13 = scalar_lea.sflag [#allocation5], %s289_s5 }
 0x237   : > { %s1029_s27 = sshll.u32 %s1869_s24, 6 }
 0x238   : > { %s761_s18 = scalar_lea.hbm %s1871_s30, %s1029_s27  ;;  %s1352_s17 = scalar_lea.hbm %s1871_s30, 128 }
 0x239   : > { %s764_s10 = sshll.u32 %s761_s18, 4  ;;  %s765_s10 = int_to_ptr.hbm [resolvable:$true] %s764_s10 }
 0x23a   : > { %s1346_s14 = sshra.s32 %s765_s10, 4  ;;  %s1347_s14 = int_to_ptr.hbm [resolvable:$true] %s1346_s14 }
 0x23b   : > { %s1348_s11 = scalar_lea.hbm %s1347_s14, 64  ;;  %p1353_p11 = scmp.lt.s32.totalorder %s1347_s14, %s1871_s30 }
 0x23c   : > { %p1349_p6 = scmp.ne.s32.totalorder %s1347_s14, %s1348_s11  ;;  %p1354_p0 = scmp.lt.s32.totalorder %s1352_s17, %s1348_s11 }
 0x23e   : > { %p1350_p13 = pnand %p1349_p6, %p1610_p8  ;;  %p1355_p3 = por %p1354_p0, %p1353_p11 }
 0x240   : > { %p1351_p7 = pneg %p1350_p13 }
 0x242   : > { %p1356_p5 = pnand %p1355_p3, %p1351_p7 }
 0x244   : > { %1359 = shalt.err (!%p1356_p5)
}
 0x245   : > { %s1493_s5 = smov 64   ;;  %s1494_s21 = smov 4  }
 0x246   : > { %1101 = dma.vmem_to_hbm [thread:$0]  (%p1610_p8), %s763_s4, 1024, %s765_s10, %s750_s13, %s1493_s5, %s1493_s5, %s1494_s21  }
 0x247 PF: > { %s1872_s7 = sld [smem:[#allocation14_spill]]  ;;  %p1121_p10 = scmp.ge.s32.totalorder %s1486_s28, 2 }
 0x249   : > { %p1115_p2 = pnand %p1121_p10, %p1616_p12 }
 0x24b   : > { %p1116_p9 = pneg %p1115_p2 }
 0x24d   : > { %s779_s6 = sand.u32 1, %s1872_s7  }
 0x24e   : > { %s780_s8 = scalar_lea.sflag [#allocation5], %s779_s6 }
 0x24f   : > { %1429 = dma.done.wait (%p1116_p9), %s780_s8, 1024  }
 0x250   : > { %1431 = vsyncadd (%p1116_p9), %s780_s8, 4294966272  ;;  %s23_s28 = sadd.s32 1, %s1486_s28   ;;  %s1875_s25 = sld [smem:[#allocation15_spill]] }
 0x251   : > { %p1777_p4 = scmp.ge.s32.totalorder %s23_s28, 6   ;;  %s1876_s17 = sld [smem:[#allocation23_spill]] }
 0x252   : > { %s1877_s27 = sld [smem:[#allocation16_spill]]  ;;  %s1883_s15 = smov %s1438_s16 }
 0x253   : > { %s1878_s23 = sld [smem:[#allocation24_spill]]  ;;  %s1885_s18 = smov %s1450_s19 }
 0x254   : > { %s1879_s12 = sld [smem:[#allocation18_spill]]  ;;  %s1886_s19 = smov %s1454_s20 }
 0x255   : > { %s1880_s2 = sld [smem:[#allocation21_spill]]  ;;  %s1887_s20 = smov %s1686_s3 }
 0x256   : > { %s1881_s4 = sld [smem:[#allocation22_spill]]  ;;  %s1884_s16 = smov %s1875_s25 }
 0x257   : > { %s1888_s21 = smov %s1462_s22  ;;  %s1890_s24 = smov %s1478_s26 }
 0x258   : > { %s1889_s22 = smov %s1877_s27  ;;  %22 = sbr.rel (!%p1777_p4) target bundleno = 17 (0x11), region = 106 }
 0x25a   : > { %s1891_s25 = smov %s1879_s12 }
 0x25b   : > { %s1892_s26 = smov %s1880_s2 }
 0x25c   : > { %s1893_s27 = smov %s1881_s4 }
 0x25d   :  { %786 = vsyncpa [#allocation4], 1 }
 0x25e   :  { %788 = vsyncpa [#allocation4 + $0x1], 1 }
 0x25f   :  { %789 = vsyncpa [#allocation7], 1 }
 0x260   :  { %791 = vsyncpa [#allocation7 + $0x1], 1 }
 0x261   :  { %792 = vsyncpa [#allocation5], 1 }
 0x262   :  { %794 = vsyncpa [#allocation5 + $0x1], 1 }

</bundles_post_ra>
